<compile_context>
chip_gen: v5e
topology: v5e:2x2
jax: 0.10.0
libtpu: 0.0.40
codegen_flags: <defaults>
</compile_context>

<pallas_src>
import functools

import jax
import jax.numpy as jnp
from jax.experimental import pallas as pl
from jax.experimental.pallas import tpu as pltpu


def shuffle_attention_kernel(x_ref, p_ref, o_ref, *, eps):
    """One block = TB group-batches, all group channels, full spatial extent.

    x_ref: (TB, Cg, HW)  activations, HW on the 128-lane axis
    p_ref: (6, Ch, 1)    per-channel params [cweight, cbias, sweight, sbias, gn_w, gn_b]
    o_ref: (TB, Cg, HW)  output (pre channel-shuffle), same layout
    """
    Cg = x_ref.shape[1]
    HW = x_ref.shape[2]
    Ch = Cg // 2
    inv_hw = jnp.float32(1.0 / HW)

    # Load each half directly from the VMEM ref (no full-tile materialize + slice).
    x0 = x_ref[:, :Ch, :].astype(jnp.float32)   # channel-attention half
    x1 = x_ref[:, Ch:, :].astype(jnp.float32)   # spatial-attention half

    cw = p_ref[0]   # (Ch, 1) -- channel axis on sublanes, broadcasts along lanes
    cb = p_ref[1]
    sw = p_ref[2]
    sb = p_ref[3]
    gw = p_ref[4]
    gb = p_ref[5]

    # --- channel attention: global average pool -> per-channel affine -> sigmoid gate ---
    m0 = jnp.sum(x0, axis=-1, keepdims=True) * inv_hw           # (TB, Ch, 1)
    gate0 = jax.nn.sigmoid(cw * m0 + cb)                        # (TB, Ch, 1)
    o_ref[:, :Ch, :] = (x0 * gate0).astype(o_ref.dtype)         # lane-dense store

    # --- spatial attention: per-channel GroupNorm -> affine -> sigmoid gate ---
    m1 = jnp.sum(x1, axis=-1, keepdims=True) * inv_hw
    d = x1 - m1
    var1 = jnp.sum(d * d, axis=-1, keepdims=True) * inv_hw      # biased variance
    xn = d * jax.lax.rsqrt(var1 + eps)
    xn = gw * xn + gb
    gate1 = jax.nn.sigmoid(sw * xn + sb)
    o_ref[:, Ch:, :] = (x1 * gate1).astype(o_ref.dtype)         # lane-dense store


def _pick_group_tile(bg, bytes_per_group, target_steps=4, block_budget_bytes=2 << 20):
    """Largest divisor of bg that keeps the block within budget and gives >= target_steps steps."""
    cap = max(1, block_budget_bytes // max(1, bytes_per_group))
    if bg >= target_steps:
        cap = min(cap, bg // target_steps)
    tb = 1
    for d in range(1, bg + 1):
        if bg % d == 0 and d <= cap:
            tb = d
    return tb


def shuffle_attention_forward(x, cweight, cbias, sweight, sbias,
                              gn_weight, gn_bias, *, G=8, eps=1e-5):
    """Shuffle_Attention.forward. Input/output NCHW."""
    b, c, h, w = x.shape
    assert c % (2 * G) == 0, "channel must be divisible by 2*G"
    Cg = c // G           # channels per group
    Ch = Cg // 2          # channels per half-group
    BG = b * G
    HW = h * w

    # (B, C, H, W) -> (B*G, Cg, H*W): pure contiguous reshape, no data movement.
    xr = x.reshape(BG, Cg, HW)

    # Pack the six tiny per-channel parameter vectors into one (6, Ch, 1) VMEM input.
    params = jnp.stack([
        cweight.reshape(Ch), cbias.reshape(Ch),
        sweight.reshape(Ch), sbias.reshape(Ch),
        gn_weight.reshape(Ch), gn_bias.reshape(Ch),
    ], axis=0).reshape(6, Ch, 1).astype(jnp.float32)

    TB = _pick_group_tile(BG, Cg * HW * x.dtype.itemsize)

    out = pl.pallas_call(
        functools.partial(shuffle_attention_kernel, eps=float(eps)),
        out_shape=jax.ShapeDtypeStruct((BG, Cg, HW), x.dtype),
        grid=(BG // TB,),
        in_specs=[
            pl.BlockSpec((TB, Cg, HW), lambda i: (i, 0, 0)),
            pl.BlockSpec((6, Ch, 1), lambda i: (0, 0, 0)),
        ],
        out_specs=pl.BlockSpec((TB, Cg, HW), lambda i: (i, 0, 0)),
        compiler_params=pltpu.CompilerParams(
            dimension_semantics=("parallel",)),
    )(xr, params)

    # Back to NCHW, then channel_shuffle(groups=2): a pure channel permutation.
    # TODO(synk): the shuffle is a strided channel permutation that can't be expressed
    # as a rectangular output BlockSpec, so it stays as wrapper glue (one XLA copy pass).
    out = out.reshape(b, c, h, w)
    out = out.reshape(b, 2, c // 2, h, w)
    out = jnp.transpose(out, (0, 2, 1, 3, 4))
    return out.reshape(b, c, h, w)


def _reference(x, cweight, cbias, sweight, sbias, gn_weight, gn_bias, *, G=8, eps=1e-5):
    """Pure-JAX reference mirroring the PyTorch forward."""
    b, c, h, w = x.shape
    Ch = c // (2 * G)
    xr = x.reshape(b * G, c // G, h, w)
    x0, x1 = jnp.split(xr, 2, axis=1)
    # channel attention branch
    xc = jnp.mean(x0, axis=(2, 3), keepdims=True)
    xc = cweight * xc + cbias
    xc = x0 * jax.nn.sigmoid(xc)
    # spatial attention branch (GroupNorm with num_groups == num_channels)
    m = jnp.mean(x1, axis=(2, 3), keepdims=True)
    v = jnp.mean((x1 - m) ** 2, axis=(2, 3), keepdims=True)
    xs = (x1 - m) / jnp.sqrt(v + eps)
    xs = xs * gn_weight.reshape(1, Ch, 1, 1) + gn_bias.reshape(1, Ch, 1, 1)
    xs = sweight * xs + sbias
    xs = x1 * jax.nn.sigmoid(xs)
    out = jnp.concatenate([xc, xs], axis=1).reshape(b, c, h, w)
    # channel_shuffle(out, 2)
    out = out.reshape(b, 2, c // 2, h, w).transpose(0, 2, 1, 3, 4).reshape(b, c, h, w)
    return out


if __name__ == "__main__":
    key = jax.random.PRNGKey(0)
    kx, kc1, kc2, ks1, ks2, kg1, kg2 = jax.random.split(key, 7)

    # Small shapes consistent with the module: G=8 (default), channel divisible by 2*G.
    b, channel, h, w, G = 2, 128, 16, 16, 8
    Ch = channel // (2 * G)

    x = jax.random.normal(kx, (b, channel, h, w), jnp.float32)
    # Parameters (module init is zeros/ones; perturb so every path is exercised).
    cweight = 0.1 * jax.random.normal(kc1, (1, Ch, 1, 1), jnp.float32)
    cbias = 1.0 + 0.1 * jax.random.normal(kc2, (1, Ch, 1, 1), jnp.float32)
    sweight = 0.1 * jax.random.normal(ks1, (1, Ch, 1, 1), jnp.float32)
    sbias = 1.0 + 0.1 * jax.random.normal(ks2, (1, Ch, 1, 1), jnp.float32)
    gn_weight = 1.0 + 0.1 * jax.random.normal(kg1, (Ch,), jnp.float32)   # gn.weight
    gn_bias = 0.1 * jax.random.normal(kg2, (Ch,), jnp.float32)           # gn.bias

    out = shuffle_attention_forward(x, cweight, cbias, sweight, sbias,
                                    gn_weight, gn_bias, G=G)
    out = jax.block_until_ready(out)

    ref = _reference(x, cweight, cbias, sweight, sbias, gn_weight, gn_bias, G=G)
    assert out.shape == (b, channel, h, w)
    assert jnp.max(jnp.abs(out - ref)) < 1e-4

    print("KERNEL_OK")
</pallas_src>

<mosaic_0001>
module attributes {stable_mosaic.version = 11 : i64} {
  func.func @shuffle_attention_kernel(%arg0: i32, %arg1: memref<4x16x256xf32, #tpu.memory_space<vmem>>, %arg2: memref<6x8x1xf32, #tpu.memory_space<vmem>>, %arg3: memref<4x16x256xf32, #tpu.memory_space<vmem>>) attributes {dimension_semantics = [#tpu.dimension_semantics<parallel>], iteration_bounds = array<i64: 4>, scalar_prefetch = 0 : i64, scratch_operands = 0 : i64, tpu.core_type = #tpu.core_type<tc>, window_params = [{transform_indices = @transform_0, window_bounds = array<i64: 4, 16, 256>}, {pipeline_mode = #tpu.pipeline_mode<synchronous>, transform_indices = @transform_1, window_bounds = array<i64: 6, 8, 1>}, {transform_indices = @transform_2, window_bounds = array<i64: 4, 16, 256>}]} {
    %c0 = arith.constant 0 : index
    %c0_0 = arith.constant 0 : index
    %c0_1 = arith.constant 0 : index
    %0 = vector.load %arg1[%c0, %c0_0, %c0_1] : memref<4x16x256xf32, #tpu.memory_space<vmem>>, vector<4x8x256xf32>
    %c0_2 = arith.constant 0 : index
    %c8 = arith.constant 8 : index
    %c0_3 = arith.constant 0 : index
    %1 = vector.load %arg1[%c0_2, %c8, %c0_3] : memref<4x16x256xf32, #tpu.memory_space<vmem>>, vector<4x8x256xf32>
    %c0_4 = arith.constant 0 : index
    %c0_5 = arith.constant 0 : index
    %c0_6 = arith.constant 0 : index
    %2 = vector.load %arg2[%c0_4, %c0_5, %c0_6] : memref<6x8x1xf32, #tpu.memory_space<vmem>>, vector<1x8x1xf32>
    %3 = vector.shape_cast %2 : vector<1x8x1xf32> to vector<8x1xf32>
    %c1 = arith.constant 1 : index
    %c0_7 = arith.constant 0 : index
    %c0_8 = arith.constant 0 : index
    %4 = vector.load %arg2[%c1, %c0_7, %c0_8] : memref<6x8x1xf32, #tpu.memory_space<vmem>>, vector<1x8x1xf32>
    %5 = vector.shape_cast %4 : vector<1x8x1xf32> to vector<8x1xf32>
    %c2 = arith.constant 2 : index
    %c0_9 = arith.constant 0 : index
    %c0_10 = arith.constant 0 : index
    %6 = vector.load %arg2[%c2, %c0_9, %c0_10] : memref<6x8x1xf32, #tpu.memory_space<vmem>>, vector<1x8x1xf32>
    %7 = vector.shape_cast %6 : vector<1x8x1xf32> to vector<8x1xf32>
    %c3 = arith.constant 3 : index
    %c0_11 = arith.constant 0 : index
    %c0_12 = arith.constant 0 : index
    %8 = vector.load %arg2[%c3, %c0_11, %c0_12] : memref<6x8x1xf32, #tpu.memory_space<vmem>>, vector<1x8x1xf32>
    %9 = vector.shape_cast %8 : vector<1x8x1xf32> to vector<8x1xf32>
    %c4 = arith.constant 4 : index
    %c0_13 = arith.constant 0 : index
    %c0_14 = arith.constant 0 : index
    %10 = vector.load %arg2[%c4, %c0_13, %c0_14] : memref<6x8x1xf32, #tpu.memory_space<vmem>>, vector<1x8x1xf32>
    %11 = vector.shape_cast %10 : vector<1x8x1xf32> to vector<8x1xf32>
    %c5 = arith.constant 5 : index
    %c0_15 = arith.constant 0 : index
    %c0_16 = arith.constant 0 : index
    %12 = vector.load %arg2[%c5, %c0_15, %c0_16] : memref<6x8x1xf32, #tpu.memory_space<vmem>>, vector<1x8x1xf32>
    %13 = vector.shape_cast %12 : vector<1x8x1xf32> to vector<8x1xf32>
    %cst = arith.constant dense<0.000000e+00> : vector<4x8xf32>
    %14 = vector.multi_reduction <add>, %0, %cst [2] : vector<4x8x256xf32> to vector<4x8xf32>
    %15 = vector.shape_cast %14 : vector<4x8xf32> to vector<4x8x1xf32>
    %cst_17 = arith.constant 3.906250e-03 : f32
    %16 = vector.broadcast %cst_17 : f32 to vector<4x8x1xf32>
    %17 = arith.mulf %15, %16 : vector<4x8x1xf32>
    %18 = vector.shape_cast %3 : vector<8x1xf32> to vector<1x8x1xf32>
    %19 = vector.broadcast %18 : vector<1x8x1xf32> to vector<4x8x1xf32>
    %20 = arith.mulf %19, %17 : vector<4x8x1xf32>
    %21 = vector.shape_cast %5 : vector<8x1xf32> to vector<1x8x1xf32>
    %22 = vector.broadcast %21 : vector<1x8x1xf32> to vector<4x8x1xf32>
    %23 = arith.addf %20, %22 : vector<4x8x1xf32>
    %24 = arith.negf %23 : vector<4x8x1xf32>
    %25 = math.exp %24 : vector<4x8x1xf32>
    %cst_18 = arith.constant 1.000000e+00 : f32
    %26 = vector.broadcast %cst_18 : f32 to vector<4x8x1xf32>
    %27 = arith.addf %26, %25 : vector<4x8x1xf32>
    %28 = arith.divf %26, %27 : vector<4x8x1xf32>
    %29 = vector.broadcast %28 : vector<4x8x1xf32> to vector<4x8x256xf32>
    %30 = arith.mulf %0, %29 : vector<4x8x256xf32>
    %c0_19 = arith.constant 0 : index
    %c0_20 = arith.constant 0 : index
    %c0_21 = arith.constant 0 : index
    %31 = vector.load %arg3[%c0_19, %c0_20, %c0_21] : memref<4x16x256xf32, #tpu.memory_space<vmem>>, vector<4x8x256xf32>
    tpu.vector_store %arg3[%c0_19, %c0_20, %c0_21], %30 {strides = array<i32>} : memref<4x16x256xf32, #tpu.memory_space<vmem>>, vector<4x8x256xf32>,
    %cst_22 = arith.constant dense<0.000000e+00> : vector<4x8xf32>
    %32 = vector.multi_reduction <add>, %1, %cst_22 [2] : vector<4x8x256xf32> to vector<4x8xf32>
    %33 = vector.shape_cast %32 : vector<4x8xf32> to vector<4x8x1xf32>
    %cst_23 = arith.constant 3.906250e-03 : f32
    %34 = vector.broadcast %cst_23 : f32 to vector<4x8x1xf32>
    %35 = arith.mulf %33, %34 : vector<4x8x1xf32>
    %36 = vector.broadcast %35 : vector<4x8x1xf32> to vector<4x8x256xf32>
    %37 = arith.subf %1, %36 : vector<4x8x256xf32>
    %38 = arith.mulf %37, %37 : vector<4x8x256xf32>
    %cst_24 = arith.constant dense<0.000000e+00> : vector<4x8xf32>
    %39 = vector.multi_reduction <add>, %38, %cst_24 [2] : vector<4x8x256xf32> to vector<4x8xf32>
    %40 = vector.shape_cast %39 : vector<4x8xf32> to vector<4x8x1xf32>
    %cst_25 = arith.constant 3.906250e-03 : f32
    %41 = vector.broadcast %cst_25 : f32 to vector<4x8x1xf32>
    %42 = arith.mulf %40, %41 : vector<4x8x1xf32>
    %cst_26 = arith.constant 9.99999974E-6 : f32
    %43 = vector.broadcast %cst_26 : f32 to vector<4x8x1xf32>
    %44 = arith.addf %42, %43 : vector<4x8x1xf32>
    %45 = math.rsqrt %44 : vector<4x8x1xf32>
    %46 = vector.broadcast %45 : vector<4x8x1xf32> to vector<4x8x256xf32>
    %47 = arith.mulf %37, %46 : vector<4x8x256xf32>
    %48 = vector.shape_cast %11 : vector<8x1xf32> to vector<1x8x1xf32>
    %49 = vector.broadcast %48 : vector<1x8x1xf32> to vector<4x8x256xf32>
    %50 = arith.mulf %49, %47 : vector<4x8x256xf32>
    %51 = vector.shape_cast %13 : vector<8x1xf32> to vector<1x8x1xf32>
    %52 = vector.broadcast %51 : vector<1x8x1xf32> to vector<4x8x256xf32>
    %53 = arith.addf %50, %52 : vector<4x8x256xf32>
    %54 = vector.shape_cast %7 : vector<8x1xf32> to vector<1x8x1xf32>
    %55 = vector.broadcast %54 : vector<1x8x1xf32> to vector<4x8x256xf32>
    %56 = arith.mulf %55, %53 : vector<4x8x256xf32>
    %57 = vector.shape_cast %9 : vector<8x1xf32> to vector<1x8x1xf32>
    %58 = vector.broadcast %57 : vector<1x8x1xf32> to vector<4x8x256xf32>
    %59 = arith.addf %56, %58 : vector<4x8x256xf32>
    %60 = arith.negf %59 : vector<4x8x256xf32>
    %61 = math.exp %60 : vector<4x8x256xf32>
    %cst_27 = arith.constant 1.000000e+00 : f32
    %62 = vector.broadcast %cst_27 : f32 to vector<4x8x256xf32>
    %63 = arith.addf %62, %61 : vector<4x8x256xf32>
    %64 = arith.divf %62, %63 : vector<4x8x256xf32>
    %65 = arith.mulf %1, %64 : vector<4x8x256xf32>
    %c0_28 = arith.constant 0 : index
    %c8_29 = arith.constant 8 : index
    %c0_30 = arith.constant 0 : index
    %66 = vector.load %arg3[%c0_28, %c8_29, %c0_30] : memref<4x16x256xf32, #tpu.memory_space<vmem>>, vector<4x8x256xf32>
    tpu.vector_store %arg3[%c0_28, %c8_29, %c0_30], %65 {strides = array<i32>} : memref<4x16x256xf32, #tpu.memory_space<vmem>>, vector<4x8x256xf32>,
    return
  }
  func.func @transform_0(%arg0: i32) -> (i32, i32, i32) {
    %c0_i32 = arith.constant 0 : i32
    %c0_i32_0 = arith.constant 0 : i32
    %c0_i32_1 = arith.constant 0 : i32
    return %arg0, %c0_i32, %c0_i32_0 : i32, i32, i32
  }
  func.func @transform_1(%arg0: i32) -> (i32, i32, i32) {
    %c0_i32 = arith.constant 0 : i32
    %c0_i32_0 = arith.constant 0 : i32
    %c0_i32_1 = arith.constant 0 : i32
    %c0_i32_2 = arith.constant 0 : i32
    return %c0_i32, %c0_i32_0, %c0_i32_1 : i32, i32, i32
  }
  func.func @transform_2(%arg0: i32) -> (i32, i32, i32) {
    %c0_i32 = arith.constant 0 : i32
    %c0_i32_0 = arith.constant 0 : i32
    %c0_i32_1 = arith.constant 0 : i32
    return %arg0, %c0_i32, %c0_i32_0 : i32, i32, i32
  }
}

</mosaic_0001>

<bundles_post_ra>
// kernel: tpu_custom_call.1
= control target key start
LH: loop header
LB: loop body
LE: loop exit
PB: predicated region body
PF: predicated region fallthrough
CT: control target
= control target key end

     0   :  { %7 = vsyncpa [#allocation3], 0  ;;  %s1413_s0 = inlined_call_operand.hbm [shape: f32[16,16,256], index: 0, kind: input, shape index: {}]   ;;  %s1414_s1 = inlined_call_operand.vmem [shape: f32[6,8,1], index: 1, kind: input, shape index: {}]   ;;  %s1415_s2 = inlined_call_operand.hbm [shape: f32[16,16,256], index: 2, kind: output, shape index: {}]  }
   0x1   :  { %9 = vsyncpa [#allocation3 + $0x1], 0 }
   0x2   :  { %10 = vsyncpa [#allocation4], 0 }
   0x3   :  { %12 = vsyncpa [#allocation4 + $0x1], 0  ;;  %s1005_s9 = smov 0   ;;  %s1007_s10 = smov 0  }
   0x4   :  { %s1009_s11 = smov 0   ;;  %s1011_s12 = smov 0  }
   0x5 LB: > { %s1026_s13 = sadd.s32 4294967295, %s983_s12   ;;  %s740_s14 = sadd.s32 4294967294, %s983_s12   ;;  %s983_s12 = sphi %s1011_s12, %s1432_s12   ;;  %s979_s11 = sphi %s1009_s11, %s1431_s11   ;;  %s975_s10 = sphi %s1007_s10, %s1430_s10   ;;  %s971_s9 = sphi %s1005_s9, %s1429_s9  }
   0x6   : > { %s1030_s15 = sadd.s32 1, %s983_s12   ;;  %s25_s16 = sadd.s32 1, %s979_s11 }
   0x7   : > { %s22_s17 = ssub.s32 %s983_s12, %s1030_s15  ;;  %p32_p0 = scmp.ne.s32.totalorder %s979_s11, %s975_s10 }
   0x8   : > { %p23_p1 = scmp.eq.s32.totalorder %s22_s17, 0  ;;  %p33_p2 = scmp.eq.s32.totalorder %s983_s12, 0 }
   0x9   : > { %p38_p3 = scmp.ne.s32.totalorder %s975_s10, %s971_s9  ;;  %p39_p4 = scmp.eq.s32.totalorder %s1026_s13, 0 }
   0xa   : > { %s1042_s18 = scalar_select %p23_p1, %s979_s11, %s25_s16  }
   0xb   : > { %p1044_p5 = por %p33_p2, %p32_p0  ;;  %p1048_p6 = por %p39_p4, %p38_p3 }
   0xc   : > { %p83_p7 = scmp.eq.s32.totalorder %s1026_s13, 3  ;;  %p89_p8 = scmp.eq.s32.totalorder %s740_s14, 3 }
   0xd   : > { %p789_p9 = scmp.lt.s32.totalorder %s983_s12, 4  ;;  %s112_s23 = sand.u32 1, %s979_s11  }
   0xe   : > { %p1054_p10 = por %p83_p7, %p32_p0  ;;  %p1058_p11 = por %p89_p8, %p38_p3 }
   0xf   : > { %s774_s24 = sshll.u32 %s983_s12, 7  ;;  %s743_s25 = sshll.u32 %s112_s23, 7 }
  0x10   : > { %s122_s28 = scalar_lea.hbm %s1413_s0, %s774_s24  ;;  %s116_s30 = scalar_lea.vmem [#allocation2], %s743_s25 }
  0x11   : > { %s123_s29 = sshll.u32 %s122_s28, 4  ;;  %s125_s3 = sshll.u32 %s116_s30, 4  ;;  %s124_s29 = int_to_ptr.hbm [resolvable:$true] %s123_s29  ;;  %s126_s3 = int_to_ptr.vmem [resolvable:$true] %s125_s3 }
  0x12   : > { %p1069_p12 = pnand %p789_p9, %p1044_p5  ;;  %p747_p13 = scmp.ge.s32.totalorder %s983_s12, 1 }
  0x13   : > { %p133_p0 = scmp.lt.s32.totalorder %s983_s12, 5  ;;  %s113_s5 = scalar_lea.sflag [#allocation3], %s112_s23 }
  0x14   : > { %s887_s6 = sshra.s32 %s124_s29, 4  ;;  %p891_p2 = pneg %p1069_p12  ;;  %s888_s6 = int_to_ptr.hbm [resolvable:$true] %s887_s6 }
  0x15   : > { %s889_s7 = scalar_lea.hbm %s888_s6, 128  ;;  %s894_s16 = scalar_lea.hbm %s1413_s0, 512 }
  0x16   : > { %p890_p1 = scmp.ne.s32.totalorder %s888_s6, %s889_s7  ;;  %p895_p5 = scmp.lt.s32.totalorder %s888_s6, %s1413_s0 }
  0x17   : > { %p896_p7 = scmp.lt.s32.totalorder %s894_s16, %s889_s7 }
  0x18   : > { %p892_p3 = pnand %p891_p2, %p890_p1 }
  0x19   : > { %p897_p8 = por %p896_p7, %p895_p5 }
  0x1a   : > { %p893_p4 = pneg %p892_p3 }
  0x1c   : > { %p898_p9 = pnand %p897_p8, %p893_p4 }
  0x1e   : > { %901 = shalt.err (!%p898_p9)
}
  0x1f   : > { %s985_s23 = smov 256   ;;  %s986_s24 = smov 16  }
  0x20   : > { %784 = dma.hbm_to_vmem [thread:$0]  (!%p1069_p12), %s124_s29, 2048, %s126_s3, %s113_s5, %s985_s23, %s985_s23, %s986_s24  }
  0x21   : > { %p134_p1 = pnand %p747_p13, %p133_p0 }
  0x22   : > { %s1090_s25 = sand.u32 (!%p134_p1), 1, %s975_s10  }
  0x23   : > { %137 = sbr.rel (%p134_p1) target bundleno = 417 (0x1a1), region = 28  ;;  %s748_s26 = sshll.u32 (!%p134_p1), %s1090_s25, 7 }
  0x24   : > { %s140_s27 = scalar_lea.sflag (!%p134_p1), [#allocation3], %s1090_s25  ;;  %s143_s28 = scalar_lea.vmem (!%p134_p1), [#allocation2], %s748_s26 }
  0x28   : > { %962 = dma.done.wait (%p1048_p6), %s140_s27, 2048  }
  0x29   : > { %964 = vsyncadd (%p1048_p6), %s140_s27, 4294965248  ;;  %v1100_v0 = vld [vmem:[%s143_s28 + $0x50] sm:$0xff]  ;;  %v1102_v1 = vld [vmem:[%s143_s28 + $0x58] sm:$0xff]  ;;  %v987_v24 = vmov 0   ;;  %s1250_s19 = scalar_lea.vmem [#allocation5], %s748_s26  ;;  %s776_s23 = sshll.u32 %s1026_s13, 7 }
  0x2a   : > { %v1104_v2 = vld [vmem:[%s143_s28 + $0x10] sm:$0xff]  ;;  %v336_v3 = vadd.f32 %v1102_v1, %v1100_v0  ;;  %v1108_v4 = vld [vmem:[%s143_s28 + $0x18] sm:$0xff]  ;;  %v1112_v6 = vld [vmem:[%s143_s28] sm:$0xff]  ;;  %830 = vset.pattern.permute.xlu2 %v987_v24  ;;  %828 = vset.pattern.permute.xlu0 %v987_v24  ;;  %s663_s27 = scalar_lea.hbm %s1415_s2, %s776_s23  ;;  %s664_s13 = sshll.u32 %s1250_s19, 4  ;;  %s665_s13 = int_to_ptr.vmem [resolvable:$true] %s664_s13 }
  0x2b   : > { %v330_v5 = vadd.f32 %v1108_v4, %v1104_v2  ;;  %v1114_v7 = vld [vmem:[%s143_s28 + $0x8] sm:$0xff]  ;;  %v1116_v8 = vld [vmem:[%s143_s28 + $0x70] sm:$0xff]  ;;  %v1118_v9 = vld [vmem:[%s143_s28 + $0x78] sm:$0xff]  ;;  %829 = vset.pattern.permute.xlu1 %v987_v24  ;;  %s651_s20 = scalar_lea.sflag [#allocation4], %s1090_s25  ;;  %s937_s5 = scalar_lea.hbm %s1415_s2, 512 }
  0x2c   : > { %337 = vadd.xlane.f32.xlu1 %v336_v3  ;;  %v194_v10 = vadd.f32 %v1114_v7, %v1112_v6  ;;  %v1122_v11 = vld [vmem:[%s143_s28 + $0x30] sm:$0xff]  ;;  %v1124_v12 = vld [vmem:[%s143_s28 + $0x38] sm:$0xff]  ;;  %v339_v13 = vadd.f32 %v1118_v9, %v1116_v8  ;;  %v1128_v14 = vld [vmem:[%s143_s28 + $0x20] sm:$0xff] }
  0x2d   : > { %331 = vadd.xlane.f32.xlu0 %v330_v5  ;;  %v1130_v15 = vld [vmem:[%s143_s28 + $0x28] sm:$0xff]  ;;  %v333_v16 = vadd.f32 %v1124_v12, %v1122_v11  ;;  %v1136_v18 = vld [vmem:[%s143_s28 + $0x60] sm:$0xff]  ;;  %v751_v3 = vld [vmem:[%s1414_s1 + $0x10] sm:$0xff] }
  0x2e   : > { %195 = vadd.xlane.f32.xlu2 %v194_v10  ;;  %v197_v17 = vadd.f32 %v1130_v15, %v1128_v14  ;;  %v1138_v19 = vld [vmem:[%s143_s28 + $0x68] sm:$0xff]  ;;  %v1140_v20 = vld [vmem:[%s143_s28 + $0x40] sm:$0xff] }
  0x2f   : > { %v1142_v21 = vld [vmem:[%s143_s28 + $0x48] sm:$0xff]  ;;  %v203_v22 = vadd.f32 %v1138_v19, %v1136_v18  ;;  %v183_v37 = vld [vmem:[%s1414_s1] sm:$0xff]  ;;  %s666_s28 = sshll.u32 %s663_s27, 4  ;;  %s667_s28 = int_to_ptr.hbm [resolvable:$true] %s666_s28 }
  0x30   : > { %v200_v23 = vadd.f32 %v1142_v21, %v1140_v20  ;;  %v750_v46 = vld [vmem:[%s1414_s1 + $0x8] sm:$0xff]  ;;  %s931_s29 = sshra.s32 %s667_s28, 4  ;;  %s932_s29 = int_to_ptr.hbm [resolvable:$true] %s931_s29 }
  0x31   : > { %v754_v5 = vld [vmem:[%s1414_s1 + $0x28] sm:$0xff]  ;;  %s933_s30 = scalar_lea.hbm %s932_s29, 128  ;;  %p938_p0 = scmp.lt.s32.totalorder %s932_s29, %s1415_s2 }
  0x32   : > { %p934_p6 = scmp.ne.s32.totalorder %s932_s29, %s933_s30  ;;  %p939_p2 = scmp.lt.s32.totalorder %s937_s5, %s933_s30 }
  0x34   : > { %340 = vadd.xlane.f32.xlu1 %v339_v13  ;;  %p935_p12 = pnand %p934_p6, %p1054_p10  ;;  %p940_p3 = por %p939_p2, %p938_p0 }
  0x35   : > { %334 = vadd.xlane.f32.xlu0 %v333_v16  ;;  %v753_v16 = vld [vmem:[%s1414_s1 + $0x20] sm:$0xff] }
  0x36   : > { %198 = vadd.xlane.f32.xlu2 %v197_v17  ;;  %p936_p13 = pneg %p935_p12 }
  0x38   : > { %p941_p4 = pnand %p940_p3, %p936_p13 }
  0x3c   : > { %204 = vadd.xlane.f32.xlu1 %v203_v22 }
  0x3d   : > { %201 = vadd.xlane.f32.xlu0 %v200_v23 }
  0x9f   : > { %v338_v25 = vpop.xlane.xlu1 %337 }
  0xa0   : > { %v344_v26 = vmul.f32 0.00390625, %v338_v25  ;;  %v332_v27 = vpop.xlane.xlu0 %331 }
  0xa1   : > { %v342_v28 = vmul.f32 0.00390625, %v332_v27  ;;  %v196_v38 = vpop.xlane.xlu2 %195 }
  0xa2   : > { %v1149_v29 = vsub.f32 %v1100_v0, %v344_v26  ;;  %v1152_v30 = vsub.f32 %v1102_v1, %v344_v26  ;;  %v206_v40 = vmul.f32 0.00390625, %v196_v38 }
  0xa3   : > { %v1155_v31 = vsub.f32 %v1104_v2, %v342_v28  ;;  %v1158_v32 = vsub.f32 %v1108_v4, %v342_v28 }
  0xa4   : > { %v358_v33 = vmul.f32 %v1149_v29, %v1149_v29  ;;  %v359_v34 = vmul.f32 %v1152_v30, %v1152_v30  ;;  %v210_v44 = vmul.f32 %v206_v40, %v183_v37 }
  0xa5   : > { %v354_v35 = vmul.f32 %v1155_v31, %v1155_v31  ;;  %v355_v36 = vmul.f32 %v1158_v32, %v1158_v32 }
  0xa6   : > { %v368_v39 = vadd.f32 %v359_v34, %v358_v33  ;;  %v214_v49 = vadd.f32 %v750_v46, %v210_v44 }
  0xa7   : > { %v362_v41 = vadd.f32 %v355_v36, %v354_v35  ;;  %v341_v42 = vpop.xlane.xlu1 %340 }
  0xa8   : > { %v335_v43 = vpop.xlane.xlu0 %334  ;;  %369 = vadd.xlane.f32.xlu1 %v368_v39  ;;  %v755_v54 = vmul.f32 -1.442695, %v214_v49 }
  0xa9   : > { %v343_v45 = vmul.f32 0.00390625, %v335_v43  ;;  %363 = vadd.xlane.f32.xlu2 %v362_v41  ;;  %v199_v26 = vpop.xlane.xlu2 %198 }
  0xaa   : > { %831 = vpow2.f32 %v755_v54  ;;  %v207_v35 = vmul.f32 0.00390625, %v199_v26 }
  0xab   : > { %v1175_v47 = vsub.f32 %v1122_v11, %v343_v45  ;;  %v1178_v48 = vsub.f32 %v1124_v12, %v343_v45  ;;  %v345_v45 = vmul.f32 0.00390625, %v341_v42 }
  0xac   : > { %v211_v40 = vmul.f32 %v207_v35, %v183_v37 }
  0xad   : > { %v356_v50 = vmul.f32 %v1175_v47, %v1175_v47  ;;  %v357_v51 = vmul.f32 %v1178_v48, %v1178_v48 }
  0xae   : > { %v215_v49 = vadd.f32 %v750_v46, %v211_v40 }
  0xaf   : > { %v365_v52 = vadd.f32 %v357_v51, %v356_v50  ;;  %v205_v53 = vpop.xlane.xlu1 %204 }
  0xb0   : > { %v209_v55 = vmul.f32 0.00390625, %v205_v53  ;;  %v202_v56 = vpop.xlane.xlu0 %201  ;;  %v832_v60 = vpop.eup %831  ;;  %v756_v53 = vmul.f32 -1.442695, %v215_v49 }
  0xb1   : > { %366 = vadd.xlane.f32.xlu0 %v365_v52  ;;  %v208_v57 = vmul.f32 0.00390625, %v202_v56  ;;  %v230_v62 = vadd.f32 1.0, %v832_v60  ;;  %v1194_v52 = vsub.f32 %v1116_v8, %v345_v45  ;;  %v1197_v56 = vsub.f32 %v1118_v9, %v345_v45 }
  0xb2   : > { %v213_v58 = vmul.f32 %v209_v55, %v183_v37 }
  0xb3   : > { %v212_v59 = vmul.f32 %v208_v57, %v183_v37  ;;  %833 = vrcp.f32 %v230_v62  ;;  %v245_v27 = vand.u32 2147483648, %v230_v62  ;;  %vm239_vm0 = vweird.f32 %v230_v62 }
  0xb4   : > { %v217_v61 = vadd.f32 %v750_v46, %v213_v58  ;;  %v243_v33 = vand.u32 2147483647, %v230_v62  ;;  %v360_v37 = vmul.f32 %v1194_v52, %v1194_v52  ;;  %v361_v60 = vmul.f32 %v1197_v56, %v1197_v56 }
  0xb5   : > { %v216_v63 = vadd.f32 %v750_v46, %v212_v59  ;;  %v246_v38 = vor.u32 1.1754944e-38, %v245_v27 }
  0xb6   : > { %v758_v10 = vmul.f32 -1.442695, %v217_v61  ;;  %vm244_vm3 = vcmp.eq.f32.partialorder %v243_v33, 8.507059e+37 }
  0xb7   : > { %v757_v13 = vmul.f32 -1.442695, %v216_v63 }
  0xb8   : > { %835 = vpow2.f32 %v758_v10 }
  0xb9   : > { %837 = vpow2.f32 %v757_v13  ;;  %v834_v17 = vpop.eup %833 }
  0xba   : > { %v235_v23 = vmul.f32 %v834_v17, %v230_v62  ;;  %vm240_vm1 = vweird.f32 %v834_v17 }
  0xbb   : > { %vm241_vm2 = vmor %vm239_vm0, %vm240_vm1 }
  0xbc   : > { %v236_v28 = vsub.f32 1.0, %v235_v23 }
  0xbe   : > { %v836_v22 = vpop.eup %835  ;;  %v237_v36 = vmul.f32 %v834_v17, %v236_v28 }
  0xbf   : > { %v838_v24 = vpop.eup %837  ;;  %v233_v25 = vadd.f32 1.0, %v836_v22 }
  0xc0   : > { %v232_v34 = vadd.f32 1.0, %v838_v24  ;;  %v238_v39 = vadd.f32 %v834_v17, %v237_v36  ;;  %v371_v24 = vadd.f32 %v361_v60, %v360_v37 }
  0xc1   : > { %458 = vperm.xlu2 %830, %v751_v3   ;;  %445 = vperm.xlu1 %829, %v754_v5   ;;  %839 = vrcp.f32 %v233_v25  ;;  %v290_v59 = vand.u32 2147483648, %v233_v25  ;;  %vm284_vm4 = vweird.f32 %v233_v25  ;;  %v288_v46 = vand.u32 2147483647, %v233_v25 }
  0xc2   : > { %841 = vrcp.f32 %v232_v34  ;;  %v242_v41 = vsel %vm241_vm2, %v834_v17, %v238_v39  ;;  %v275_v63 = vand.u32 2147483648, %v232_v34  ;;  %vm269_vm8 = vweird.f32 %v232_v34 }
  0xc3   : > { %v247_v43 = vsel %vm244_vm3, %v246_v38, %v242_v41  ;;  %843 = vpow2.f32 %v756_v53  ;;  %v291_v61 = vor.u32 1.1754944e-38, %v290_v59  ;;  %vm289_vm7 = vcmp.eq.f32.partialorder %v288_v46, 8.507059e+37 }
  0xc4   : > { %v273_v13 = vand.u32 2147483647, %v232_v34 }
  0xc5   : > { %432 = vperm.xlu0 %828, %v753_v16   ;;  %v276_v16 = vor.u32 1.1754944e-38, %v275_v63 }
  0xc6   : > { %vm274_vm11 = vcmp.eq.f32.partialorder %v273_v13, 8.507059e+37 }
  0xc7   : > { %v840_v44 = vpop.eup %839 }
  0xc8   : > { %v842_v50 = vpop.eup %841  ;;  %v280_v51 = vmul.f32 %v840_v44, %v233_v25  ;;  %vm285_vm5 = vweird.f32 %v840_v44 }
  0xc9   : > { %296 = vperm.xlu1 %829, %v247_v43   ;;  %v265_v55 = vmul.f32 %v842_v50, %v232_v34  ;;  %vm286_vm6 = vmor %vm284_vm4, %vm285_vm5  ;;  %vm270_vm9 = vweird.f32 %v842_v50  ;;  %v844_v17 = vpop.eup %843  ;;  %v752_v34 = vld [vmem:[%s1414_s1 + $0x18] sm:$0xff] }
  0xca   : > { %v281_v54 = vsub.f32 1.0, %v280_v51  ;;  %vm271_vm10 = vmor %vm269_vm8, %vm270_vm9  ;;  %v231_v25 = vadd.f32 1.0, %v844_v17 }
  0xcb   : > { %v266_v58 = vsub.f32 1.0, %v265_v55 }
  0xcc   : > { %v282_v57 = vmul.f32 %v840_v44, %v281_v54  ;;  %845 = vrcp.f32 %v231_v25  ;;  %vm254_vm12 = vweird.f32 %v231_v25  ;;  %v260_v35 = vand.u32 2147483648, %v231_v25 }
  0xcd   : > { %v267_v62 = vmul.f32 %v842_v50, %v266_v58  ;;  %v258_v38 = vand.u32 2147483647, %v231_v25 }
  0xce   : > { %v283_v42 = vadd.f32 %v840_v44, %v282_v57  ;;  %v261_v39 = vor.u32 1.1754944e-38, %v260_v35 }
  0xcf   : > { %v268_v10 = vadd.f32 %v842_v50, %v267_v62  ;;  %vm259_vm15 = vcmp.eq.f32.partialorder %v258_v38, 8.507059e+37 }
  0xd0   : > { %v287_v3 = vsel %vm286_vm6, %v840_v44, %v283_v42 }
  0xd1   : > { %v292_v5 = vsel %vm289_vm7, %v291_v61, %v287_v3  ;;  %v272_v22 = vsel %vm271_vm10, %v842_v50, %v268_v10 }
  0xd2   : > { %311 = vperm.xlu0 %828, %v292_v5   ;;  %v277_v23 = vsel %vm274_vm11, %v276_v16, %v272_v22  ;;  %v846_v26 = vpop.eup %845 }
  0xd3   : > { %306 = vperm.xlu1 %829, %v277_v23   ;;  %v250_v27 = vmul.f32 %v846_v26, %v231_v25  ;;  %vm255_vm13 = vweird.f32 %v846_v26 }
  0xd4   : > { %vm256_vm14 = vmor %vm254_vm12, %vm255_vm13 }
  0xd5   : > { %v251_v28 = vsub.f32 1.0, %v250_v27 }
  0xd7   : > { %v252_v33 = vmul.f32 %v846_v26, %v251_v28 }
  0xd9   : > { %v253_v36 = vadd.f32 %v846_v26, %v252_v33 }
  0xdb   : > { %v257_v40 = vsel %vm256_vm14, %v846_v26, %v253_v36 }
  0xdc   : > { %v262_v41 = vsel %vm259_vm15, %v261_v39, %v257_v40 }
  0xea   : > { %372 = vadd.xlane.f32.xlu2 %v371_v24 }
 0x102   : > { %471 = vperm.xlu2 %830, %v752_v34  }
 0x10a   : > { %301 = vperm.xlu2 %830, %v262_v41  }
 0x11b   : > { %v370_v45 = vpop.xlane.xlu1 %369 }
 0x11c   : > { %v364_v44 = vpop.xlane.xlu2 %363  ;;  %v376_v51 = vmul.f32 0.00390625, %v370_v45 }
 0x11d   : > { %v374_v50 = vmul.f32 0.00390625, %v364_v44 }
 0x11e   : > { %v380_v55 = vadd.f32 1e-05, %v376_v51 }
 0x11f   : > { %v378_v54 = vadd.f32 1e-05, %v374_v50 }
 0x120   : > { %vm408_vm2 = vweird.f32 %v380_v55 }
 0x121   : > { %vm388_vm7 = vweird.f32 %v378_v54 }
 0x124   : > { %v367_v43 = vpop.xlane.xlu0 %366  ;;  %v1206_v25 = vpop.permute.xlu2 %458 }
 0x125   : > { %v375_v49 = vmul.f32 0.00390625, %v367_v43 }
 0x127   : > { %v379_v53 = vadd.f32 1e-05, %v375_v49 }
 0x129   : > { %847 = vrsqrt.f32 %v379_v53  ;;  %vm398_vm0 = vweird.f32 %v379_v53 }
 0x12a   : > { %849 = vrsqrt.f32 %v378_v54 }
 0x12b   : > { %851 = vrsqrt.f32 %v380_v55 }
 0x12f   : > { %v848_v57 = vpop.eup %847 }
 0x130   : > { %v850_v58 = vpop.eup %849  ;;  %v393_v59 = vmul.f32 %v848_v57, %v379_v53  ;;  %vm399_vm1 = vweird.f32 %v848_v57 }
 0x131   : > { %v852_v37 = vpop.eup %851  ;;  %v383_v42 = vmul.f32 %v850_v58, %v378_v54  ;;  %vm389_vm4 = vweird.f32 %v850_v58  ;;  %vm400_vm5 = vmor %vm398_vm0, %vm399_vm1 }
 0x132   : > { %v403_v46 = vmul.f32 %v852_v37, %v380_v55  ;;  %v394_v60 = vmul.f32 %v848_v57, %v393_v59  ;;  %vm409_vm3 = vweird.f32 %v852_v37  ;;  %vm390_vm8 = vmor %vm388_vm7, %vm389_vm4 }
 0x133   : > { %v384_v61 = vmul.f32 %v850_v58, %v383_v42  ;;  %vm410_vm6 = vmor %vm408_vm2, %vm409_vm3  ;;  %v1216_v40 = vpop.permute.xlu1 %445 }
 0x134   : > { %v404_v62 = vmul.f32 %v852_v37, %v403_v46  ;;  %v395_v63 = vmul.f32 0.5, %v394_v60 }
 0x135   : > { %v385_v3 = vmul.f32 0.5, %v384_v61 }
 0x136   : > { %v405_v5 = vmul.f32 0.5, %v404_v62  ;;  %v396_v10 = vsub.f32 1.5, %v395_v63 }
 0x137   : > { %v386_v13 = vsub.f32 1.5, %v385_v3  ;;  %v1210_v34 = vpop.permute.xlu0 %432 }
 0x138   : > { %v406_v16 = vsub.f32 1.5, %v405_v5  ;;  %v397_v17 = vmul.f32 %v848_v57, %v396_v10 }
 0x139   : > { %v387_v22 = vmul.f32 %v850_v58, %v386_v13 }
 0x13a   : > { %v407_v23 = vmul.f32 %v852_v37, %v406_v16  ;;  %v401_v24 = vsel %vm400_vm5, %v848_v57, %v397_v17 }
 0x13b   : > { %v391_v26 = vsel %vm390_vm8, %v850_v58, %v387_v22  ;;  %v424_v28 = vmul.f32 %v401_v24, %v1175_v47  ;;  %v425_v33 = vmul.f32 %v401_v24, %v1178_v48  ;;  %v297_v55 = vpop.permute.xlu1 %296 }
 0x13c   : > { %v411_v27 = vsel %vm410_vm6, %v852_v37, %v407_v23  ;;  %v422_v35 = vmul.f32 %v391_v26, %v1155_v31  ;;  %v423_v36 = vmul.f32 %v391_v26, %v1158_v32 }
 0x13d   : > { %v426_v38 = vmul.f32 %v411_v27, %v1149_v29  ;;  %v437_v43 = vmul.f32 %v1210_v34, %v424_v28  ;;  %v438_v47 = vmul.f32 %v1210_v34, %v425_v33  ;;  %v427_v48 = vmul.f32 %v411_v27, %v1152_v30 }
 0x13e   : > { %v435_v39 = vmul.f32 %v1210_v34, %v422_v35  ;;  %v436_v41 = vmul.f32 %v1210_v34, %v423_v36 }
 0x13f   : > { %v439_v44 = vmul.f32 %v1210_v34, %v426_v38  ;;  %v440_v32 = vmul.f32 %v1210_v34, %v427_v48  ;;  %v450_v50 = vadd.f32 %v1216_v40, %v437_v43  ;;  %v451_v51 = vadd.f32 %v1216_v40, %v438_v47 }
 0x140   : > { %v448_v29 = vadd.f32 %v1216_v40, %v435_v39  ;;  %v449_v49 = vadd.f32 %v1216_v40, %v436_v41  ;;  %v314_v38 = vmul.f32 %v297_v55, %v1112_v6  ;;  %v315_v39 = vmul.f32 %v297_v55, %v1114_v7 }
 0x141   : > { %v452_v54 = vadd.f32 %v1216_v40, %v439_v44  ;;  %v453_v30 = vadd.f32 %v1216_v40, %v440_v32  ;;  %v463_v37 = vmul.f32 %v1206_v25, %v450_v50  ;;  %v464_v59 = vmul.f32 %v1206_v25, %v451_v51 }
 0x142   : > { %v461_v57 = vmul.f32 %v1206_v25, %v448_v29  ;;  %v462_v58 = vmul.f32 %v1206_v25, %v449_v49  ;;  %322 = vst [vmem:[%s1250_s19] sm:$0xff] %v314_v38 }
 0x143   : > { %v465_v42 = vmul.f32 %v1206_v25, %v452_v54  ;;  %v466_v3 = vmul.f32 %v1206_v25, %v453_v30  ;;  %323 = vst [vmem:[%s1250_s19 + $0x8] sm:$0xff] %v315_v39 }
 0x144   : > { %v312_v26 = vpop.permute.xlu0 %311 }
 0x145   : > { %v320_v27 = vmul.f32 %v312_v26, %v1136_v18  ;;  %v321_v28 = vmul.f32 %v312_v26, %v1138_v19  ;;  %v307_v35 = vpop.permute.xlu1 %306 }
 0x146   : > { %v318_v7 = vmul.f32 %v307_v35, %v1140_v20  ;;  %v319_v48 = vmul.f32 %v307_v35, %v1142_v21 }
 0x147   : > { %328 = vst [vmem:[%s1250_s19 + $0x60] sm:$0xff] %v320_v27 }
 0x148   : > { %329 = vst [vmem:[%s1250_s19 + $0x68] sm:$0xff] %v321_v28 }
 0x149   : > { %326 = vst [vmem:[%s1250_s19 + $0x40] sm:$0xff] %v318_v7 }
 0x14a   : > { %327 = vst [vmem:[%s1250_s19 + $0x48] sm:$0xff] %v319_v48 }
 0x15d   : > { %v373_v45 = vpop.xlane.xlu2 %372 }
 0x15e   : > { %v377_v31 = vmul.f32 0.00390625, %v373_v45 }
 0x160   : > { %v381_v53 = vadd.f32 1e-05, %v377_v31 }
 0x162   : > { %853 = vrsqrt.f32 %v381_v53  ;;  %vm418_vm10 = vweird.f32 %v381_v53 }
 0x165   : > { %v1235_v46 = vpop.permute.xlu2 %471 }
 0x166   : > { %v474_v60 = vadd.f32 %v1235_v46, %v461_v57  ;;  %v475_v61 = vadd.f32 %v1235_v46, %v462_v58  ;;  %v476_v62 = vadd.f32 %v1235_v46, %v463_v37  ;;  %v477_v63 = vadd.f32 %v1235_v46, %v464_v59 }
 0x167   : > { %v478_v10 = vadd.f32 %v1235_v46, %v465_v42  ;;  %v479_v23 = vadd.f32 %v1235_v46, %v466_v3 }
 0x168   : > { %v854_v5 = vpop.eup %853  ;;  %v759_v13 = vmul.f32 -1.442695, %v474_v60  ;;  %v760_v16 = vmul.f32 -1.442695, %v475_v61  ;;  %v761_v17 = vmul.f32 -1.442695, %v476_v62 }
 0x169   : > { %v413_v22 = vmul.f32 %v854_v5, %v381_v53  ;;  %v762_v24 = vmul.f32 -1.442695, %v477_v63  ;;  %v763_v36 = vmul.f32 -1.442695, %v478_v10  ;;  %v764_v19 = vmul.f32 -1.442695, %v479_v23 }
 0x16a   : > { %855 = vpow2.f32 %v759_v13  ;;  %vm419_vm9 = vweird.f32 %v854_v5 }
 0x16b   : > { %v414_v33 = vmul.f32 %v854_v5, %v413_v22  ;;  %857 = vpow2.f32 %v760_v16  ;;  %vm420_vm11 = vmor %vm418_vm10, %vm419_vm9 }
 0x16c   : > { %859 = vpow2.f32 %v761_v17 }
 0x16d   : > { %v415_v18 = vmul.f32 0.5, %v414_v33  ;;  %861 = vpow2.f32 %v762_v24  ;;  %v302_v41 = vpop.permute.xlu2 %301 }
 0x16e   : > { %v316_v43 = vmul.f32 %v302_v41, %v1128_v14  ;;  %v317_v6 = vmul.f32 %v302_v41, %v1130_v15  ;;  %863 = vpow2.f32 %v763_v36 }
 0x16f   : > { %v416_v47 = vsub.f32 1.5, %v415_v18  ;;  %865 = vpow2.f32 %v764_v19 }
 0x170   : > { %v856_v44 = vpop.eup %855  ;;  %324 = vst [vmem:[%s1250_s19 + $0x20] sm:$0xff] %v316_v43 }
 0x171   : > { %v858_v45 = vpop.eup %857  ;;  %v417_v31 = vmul.f32 %v854_v5, %v416_v47  ;;  %v506_v14 = vadd.f32 1.0, %v856_v44  ;;  %325 = vst [vmem:[%s1250_s19 + $0x28] sm:$0xff] %v317_v6 }
 0x172   : > { %v860_v15 = vpop.eup %859  ;;  %v1262_v32 = vadd.f32 1.0, %v858_v45 }
 0x173   : > { %v862_v20 = vpop.eup %861  ;;  %v421_v29 = vsel %vm420_vm11, %v854_v5, %v417_v31  ;;  %v1265_v49 = vadd.f32 1.0, %v860_v15  ;;  %867 = vrcp.f32 %v506_v14  ;;  %v523_v57 = vand.u32 2147483647, %v506_v14 }
 0x174   : > { %v428_v21 = vmul.f32 %v421_v29, %v1194_v52  ;;  %v429_v50 = vmul.f32 %v421_v29, %v1197_v56  ;;  %v1270_v51 = vadd.f32 1.0, %v862_v20  ;;  %869 = vrcp.f32 %v1262_v32  ;;  %v864_v53 = vpop.eup %863 }
 0x175   : > { %v866_v55 = vpop.eup %865  ;;  %v525_v58 = vand.u32 2147483648, %v506_v14  ;;  %871 = vrcp.f32 %v1265_v49  ;;  %v1278_v56 = vadd.f32 1.0, %v864_v53  ;;  %vm519_vm12 = vweird.f32 %v506_v14 }
 0x176   : > { %v441_v54 = vmul.f32 %v1210_v34, %v428_v21  ;;  %v442_v30 = vmul.f32 %v1210_v34, %v429_v50  ;;  %873 = vrcp.f32 %v1270_v51  ;;  %v1283_v34 = vadd.f32 1.0, %v866_v55 }
 0x177   : > { %vm534_vm13 = vweird.f32 %v1262_v32  ;;  %vm1286_vm14 = vcmp.eq.f32.partialorder %v523_v57, 8.507059e+37  ;;  %v538_v3 = vand.u32 2147483647, %v1262_v32  ;;  %v540_v5 = vand.u32 2147483648, %v1262_v32 }
 0x178   : > { %v454_v37 = vadd.f32 %v1216_v40, %v441_v54  ;;  %v455_v52 = vadd.f32 %v1216_v40, %v442_v30  ;;  %v526_v40 = vor.u32 1.1754944e-38, %v525_v58  ;;  %vm549_vm0 = vweird.f32 %v1265_v49 }
 0x179   : > { %v868_v59 = vpop.eup %867  ;;  %v555_v22 = vand.u32 2147483648, %v1265_v49  ;;  %875 = vrcp.f32 %v1278_v56  ;;  %vm1300_vm2 = vcmp.eq.f32.partialorder %v538_v3, 8.507059e+37  ;;  %v553_v35 = vand.u32 2147483647, %v1265_v49 }
 0x17a   : > { %v467_v42 = vmul.f32 %v1206_v25, %v454_v37  ;;  %v468_v60 = vmul.f32 %v1206_v25, %v455_v52  ;;  %v515_v61 = vmul.f32 %v868_v59, %v506_v14  ;;  %v870_v62 = vpop.eup %869  ;;  %vm520_vm15 = vweird.f32 %v868_v59 }
 0x17b   : > { %v530_v16 = vmul.f32 %v870_v62, %v1262_v32  ;;  %v1295_v17 = vpop.eup %871  ;;  %vm535_vm1 = vweird.f32 %v870_v62  ;;  %vm521_vm3 = vmor %vm519_vm12, %vm520_vm15  ;;  %v541_v18 = vor.u32 1.1754944e-38, %v540_v5  ;;  %v556_v41 = vor.u32 1.1754944e-38, %v555_v22 }
 0x17c   : > { %v480_v10 = vadd.f32 %v1235_v46, %v467_v42  ;;  %v481_v13 = vadd.f32 %v1235_v46, %v468_v60  ;;  %v516_v25 = vsub.f32 1.0, %v515_v61  ;;  %v874_v28 = vpop.eup %873  ;;  %v545_v33 = vmul.f32 %v1295_v17, %v1265_v49  ;;  %vm536_vm5 = vmor %vm534_vm13, %vm535_vm1 }
 0x17d   : > { %v531_v27 = vsub.f32 1.0, %v530_v16  ;;  %v560_v39 = vmul.f32 %v874_v28, %v1270_v51  ;;  %vm564_vm4 = vweird.f32 %v1270_v51  ;;  %vm550_vm6 = vweird.f32 %v1295_v17 }
 0x17e   : > { %v765_v23 = vmul.f32 -1.442695, %v480_v10  ;;  %v766_v24 = vmul.f32 -1.442695, %v481_v13  ;;  %v517_v26 = vmul.f32 %v868_v59, %v516_v25  ;;  %v546_v19 = vsub.f32 1.0, %v545_v33  ;;  %vm1327_vm8 = vmor %vm549_vm0, %vm550_vm6 }
 0x17f   : > { %v532_v38 = vmul.f32 %v870_v62, %v531_v27  ;;  %v561_v7 = vsub.f32 1.0, %v560_v39  ;;  %v876_v47 = vpop.eup %875  ;;  %vm565_vm7 = vweird.f32 %v874_v28  ;;  %v568_v20 = vand.u32 2147483647, %v1270_v51 }
 0x180   : > { %877 = vpow2.f32 %v765_v23  ;;  %v518_v36 = vadd.f32 %v868_v59, %v517_v26  ;;  %v547_v48 = vmul.f32 %v1295_v17, %v546_v19  ;;  %v575_v14 = vmul.f32 %v876_v47, %v1278_v56  ;;  %vm1341_vm9 = vmor %vm564_vm4, %vm565_vm7 }
 0x181   : > { %879 = vpow2.f32 %v766_v24  ;;  %v533_v6 = vadd.f32 %v870_v62, %v532_v38  ;;  %v562_v31 = vmul.f32 %v874_v28, %v561_v7  ;;  %v570_v29 = vand.u32 2147483648, %v1270_v51 }
 0x182   : > { %v522_v43 = vsel %vm521_vm3, %v868_v59, %v518_v36  ;;  %881 = vrcp.f32 %v1283_v34  ;;  %v548_v32 = vadd.f32 %v1295_v17, %v547_v48  ;;  %v576_v54 = vsub.f32 1.0, %v575_v14 }
 0x183   : > { %v527_v44 = vsel %vm1286_vm14, %v526_v40, %v522_v43  ;;  %v537_v45 = vsel %vm536_vm5, %v870_v62, %v533_v6  ;;  %v563_v53 = vadd.f32 %v874_v28, %v562_v31  ;;  %v583_v30 = vand.u32 2147483647, %v1278_v56 }
 0x184   : > { %v542_v15 = vsel %vm1300_vm2, %v541_v18, %v537_v45  ;;  %v585_v55 = vand.u32 2147483648, %v1278_v56  ;;  %v552_v37 = vsel %vm1327_vm8, %v1295_v17, %v548_v32  ;;  %v634_v52 = vmul.f32 %v527_v44, %v1104_v2 }
 0x185   : > { %v635_v59 = vmul.f32 %v542_v15, %v1108_v4  ;;  %v567_v60 = vsel %vm1341_vm9, %v874_v28, %v563_v53  ;;  %v577_v61 = vmul.f32 %v876_v47, %v576_v54  ;;  %vm580_vm10 = vweird.f32 %v876_v47 }
 0x186   : > { %v878_v21 = vpop.eup %877  ;;  %vm554_vm11 = vcmp.eq.f32.partialorder %v553_v35, 8.507059e+37  ;;  %vm569_vm12 = vcmp.eq.f32.partialorder %v568_v20, 8.507059e+37  ;;  %v571_v51 = vor.u32 1.1754944e-38, %v570_v29  ;;  %642 = vst [vmem:[%s1250_s19 + $0x10] sm:$0xff] %v634_v52  ;;  %vm579_vm13 = vweird.f32 %v1278_v56 }
 0x187   : > { %v880_v57 = vpop.eup %879  ;;  %v1333_v58 = vadd.f32 1.0, %v878_v21  ;;  %v557_v63 = vsel %vm554_vm11, %v556_v41, %v552_v37  ;;  %v578_v40 = vadd.f32 %v876_v47, %v577_v61  ;;  %643 = vst [vmem:[%s1250_s19 + $0x18] sm:$0xff] %v635_v59  ;;  %vm581_vm14 = vmor %vm579_vm13, %vm580_vm10  ;;  %v586_v3 = vor.u32 1.1754944e-38, %v585_v55 }
 0x188   : > { %v1347_v42 = vadd.f32 1.0, %v880_v57  ;;  %v882_v62 = vpop.eup %881  ;;  %v572_v4 = vsel %vm569_vm12, %v571_v51, %v567_v60  ;;  %vm584_vm15 = vcmp.eq.f32.partialorder %v583_v30, 8.507059e+37  ;;  %v600_v25 = vand.u32 2147483648, %v1283_v34 }
 0x189   : > { %883 = vrcp.f32 %v1333_v58  ;;  %v590_v2 = vmul.f32 %v882_v62, %v1283_v34  ;;  %v582_v5 = vsel %vm581_vm14, %v876_v47, %v578_v40  ;;  %v636_v16 = vmul.f32 %v557_v63, %v1122_v11 }
 0x18a   : > { %885 = vrcp.f32 %v1347_v42  ;;  %v587_v13 = vsel %vm584_vm15, %v586_v3, %v582_v5  ;;  %vm595_vm0 = vweird.f32 %v882_v62  ;;  %v598_v17 = vand.u32 2147483647, %v1283_v34 }
 0x18b   : > { %v591_v10 = vsub.f32 1.0, %v590_v2  ;;  %v637_v22 = vmul.f32 %v572_v4, %v1124_v12  ;;  %v638_v24 = vmul.f32 %v587_v13, %v1100_v0  ;;  %644 = vst [vmem:[%s1250_s19 + $0x30] sm:$0xff] %v636_v16  ;;  %vm594_vm1 = vweird.f32 %v1283_v34 }
 0x18c   : > { %vm596_vm2 = vmor %vm594_vm1, %vm595_vm0  ;;  %v601_v11 = vor.u32 1.1754944e-38, %v600_v25  ;;  %vm599_vm3 = vcmp.eq.f32.partialorder %v598_v17, 8.507059e+37  ;;  %v613_v0 = vand.u32 2147483647, %v1333_v58  ;;  %v615_v36 = vand.u32 2147483648, %v1333_v58 }
 0x18d   : > { %v592_v56 = vmul.f32 %v882_v62, %v591_v10  ;;  %645 = vst [vmem:[%s1250_s19 + $0x38] sm:$0xff] %v637_v22  ;;  %vm609_vm5 = vweird.f32 %v1333_v58  ;;  %v630_v18 = vand.u32 2147483648, %v1347_v42  ;;  %v628_v43 = vand.u32 2147483647, %v1347_v42 }
 0x18e   : > { %646 = vst [vmem:[%s1250_s19 + $0x50] sm:$0xff] %v638_v24  ;;  %v616_v6 = vor.u32 1.1754944e-38, %v615_v36  ;;  %vm614_vm8 = vcmp.eq.f32.partialorder %v613_v0, 8.507059e+37  ;;  %vm624_vm9 = vweird.f32 %v1347_v42 }
 0x18f   : > { %v884_v23 = vpop.eup %883  ;;  %v593_v26 = vadd.f32 %v882_v62, %v592_v56  ;;  %v631_v48 = vor.u32 1.1754944e-38, %v630_v18  ;;  %vm629_vm11 = vcmp.eq.f32.partialorder %v628_v43, 8.507059e+37 }
 0x190   : > { %v605_v27 = vmul.f32 %v884_v23, %v1333_v58  ;;  %v886_v28 = vpop.eup %885  ;;  %vm610_vm4 = vweird.f32 %v884_v23 }
 0x191   : > { %v597_v46 = vsel %vm596_vm2, %v882_v62, %v593_v26  ;;  %v620_v12 = vmul.f32 %v886_v28, %v1347_v42  ;;  %vm625_vm6 = vweird.f32 %v886_v28  ;;  %vm611_vm7 = vmor %vm609_vm5, %vm610_vm4 }
 0x192   : > { %v606_v33 = vsub.f32 1.0, %v605_v27  ;;  %v602_v35 = vsel %vm599_vm3, %v601_v11, %v597_v46  ;;  %vm626_vm10 = vmor %vm624_vm9, %vm625_vm6 }
 0x193   : > { %v621_v38 = vsub.f32 1.0, %v620_v12  ;;  %v639_v39 = vmul.f32 %v602_v35, %v1102_v1 }
 0x194   : > { %v607_v34 = vmul.f32 %v884_v23, %v606_v33 }
 0x195   : > { %v622_v41 = vmul.f32 %v886_v28, %v621_v38  ;;  %647 = vst [vmem:[%s1250_s19 + $0x58] sm:$0xff] %v639_v39 }
 0x196   : > { %v608_v19 = vadd.f32 %v884_v23, %v607_v34 }
 0x197   : > { %v623_v1 = vadd.f32 %v886_v28, %v622_v41 }
 0x198   : > { %v612_v7 = vsel %vm611_vm7, %v884_v23, %v608_v19 }
 0x199   : > { %v617_v47 = vsel %vm614_vm8, %v616_v6, %v612_v7  ;;  %v627_v44 = vsel %vm626_vm10, %v886_v28, %v623_v1 }
 0x19a   : > { %v640_v45 = vmul.f32 %v617_v47, %v1116_v8  ;;  %v632_v31 = vsel %vm629_vm11, %v631_v48, %v627_v44 }
 0x19b   : > { %v641_v14 = vmul.f32 %v632_v31, %v1118_v9 }
 0x19c   : > { %648 = vst [vmem:[%s1250_s19 + $0x70] sm:$0xff] %v640_v45 }
 0x19d   : > { %649 = vst [vmem:[%s1250_s19 + $0x78] sm:$0xff] %v641_v14 }
 0x19e   : > { %944 = shalt.err (!%p941_p4)
}
 0x19f   : > { %s988_s25 = smov 256   ;;  %s989_s8 = smov 16  }
 0x1a0   : > { %779 = dma.vmem_to_hbm [thread:$0]  (%p1054_p10), %s665_s13, 2048, %s667_s28, %s651_s20, %s988_s25, %s988_s25, %s989_s8  }
 0x1a1 PF: > { %p790_p5 = scmp.ge.s32.totalorder %s983_s12, 2  ;;  %s681_s14 = sand.u32 1, %s971_s9  }
 0x1a2   : > { %s682_s16 = scalar_lea.sflag [#allocation4], %s681_s14 }
 0x1a3   : > { %p786_p7 = pnand %p790_p5, %p1058_p11 }
 0x1a5   : > { %p787_p8 = pneg %p786_p7 }
 0x1a7   : > { %966 = dma.done.wait (%p787_p8), %s682_s16, 2048  }
 0x1a8   : > { %968 = vsyncadd (%p787_p8), %s682_s16, 4294965248  ;;  %p15_p9 = scmp.ge.s32.totalorder %s1030_s15, 6   ;;  %s1429_s9 = smov %s975_s10 }
 0x1a9   : > { %s1430_s10 = smov %s979_s11  ;;  %s1431_s11 = smov %s1042_s18 }
 0x1aa   : > { %s1432_s12 = smov %s1030_s15  ;;  %17 = sbr.rel (!%p15_p9) target bundleno = 5 (0x5), region = 78 }
 0x1af   :  { %688 = vsyncpa [#allocation3], 1 }
 0x1b0   :  { %690 = vsyncpa [#allocation3 + $0x1], 1 }
 0x1b1   :  { %691 = vsyncpa [#allocation4], 1 }
 0x1b2   :  { %693 = vsyncpa [#allocation4 + $0x1], 1 }

</bundles_post_ra>
